<compile_context>
chip_gen: v5e
topology: v5e:2x2
jax: 0.10.0
libtpu: 0.0.40
codegen_flags: <defaults>
</compile_context>

<pallas_src>
import math
import jax
import jax.numpy as jnp
from jax.experimental import pallas as pl
from jax.experimental.pallas import tpu as pltpu


# ----------------------------------------------------------------------------- utils
def _gelu_tanh(x):
    # GELU with tanh approximation, matching torch.nn.GELU(approximate='tanh')
    c = math.sqrt(2.0 / math.pi)
    return 0.5 * x * (1.0 + jnp.tanh(c * (x + 0.044715 * x * x * x)))


def _round_up(a, b):
    return (a + b - 1) // b * b


def _vmem_capacity_bytes():
    # Physical VMEM of the current chip; conservative (v7x per-core) if unknown.
    try:
        return int(pltpu.get_tpu_info().vmem_capacity_bytes)
    except Exception:
        return 64 << 20


def _resident_vmem_bytes(tm, C, H, x_b, w_b, out_b):
    # Conservative estimate: assume everything (incl. constant-index weights) is
    # double-buffered, plus the (tm, H) f32 hidden intermediate + its cast copy.
    buf = 2
    return (buf * tm * C * (x_b + out_b)
            + buf * 2 * C * H * w_b
            + buf * (H + C) * w_b
            + tm * H * (4 + w_b))


def _streamed_vmem_bytes(tm, th, C, H, x_b, w_b, out_b):
    buf = 2
    return (buf * tm * C * (x_b + out_b)
            + buf * 2 * C * th * w_b
            + buf * (th + C) * w_b
            + tm * C * 4                 # f32 accumulator scratch
            + tm * th * (4 + w_b))       # f32 hidden chunk + cast copy


def _pick_tm(M, tm):
    # Clamp to the (sublane-aligned) token count; prefer a divisor of M to avoid the
    # extra HBM pass of a wrapper-side pad.
    tm = max(8, min(tm, _round_up(M, 8)))
    tm = _round_up(tm, 8)
    if M % tm == 0:
        return tm
    if M % 8 == 0:
        for cand in range(tm, 255, -8):
            if M % cand == 0:
                return cand
    return tm  # padding fallback


# ----------------------------------------------------------------------------- kernels
def mlp_kernel_resident(x_ref, w1_ref, b1_ref, w2_ref, b2_ref, o_ref):
    # x_ref:  (tm, C)   token tile
    # w1_ref: (C, H)    full c_fc weight (VMEM-resident, constant index_map)
    # b1_ref: (1, H)
    # w2_ref: (H, C)    full c_proj weight (VMEM-resident)
    # b2_ref: (1, C)
    # o_ref:  (tm, C)
    h = jnp.dot(x_ref[...], w1_ref[...], preferred_element_type=jnp.float32)
    h = _gelu_tanh(h + b1_ref[...].astype(jnp.float32))
    out = jnp.dot(h.astype(w2_ref.dtype), w2_ref[...],
                  preferred_element_type=jnp.float32)
    o_ref[...] = (out + b2_ref[...].astype(jnp.float32)).astype(o_ref.dtype)


def mlp_kernel_streamed(x_ref, w1_ref, b1_ref, w2_ref, b2_ref, o_ref, acc_ref):
    # x_ref:  (tm, C)   token tile
    # w1_ref: (C, th)   c_fc weight chunk
    # b1_ref: (1, th)   c_fc bias chunk
    # w2_ref: (th, C)   c_proj weight chunk
    # b2_ref: (1, C)
    # o_ref:  (tm, C)   same block across the H axis (resident accumulator output)
    # acc_ref:(tm, C)   f32 accumulator scratch
    k = pl.program_id(1)

    @pl.when(k == 0)
    def _():
        acc_ref[...] = jnp.zeros_like(acc_ref)

    h = jnp.dot(x_ref[...], w1_ref[...], preferred_element_type=jnp.float32)
    h = _gelu_tanh(h + b1_ref[...].astype(jnp.float32))
    acc_ref[...] += jnp.dot(h.astype(w2_ref.dtype), w2_ref[...],
                            preferred_element_type=jnp.float32)

    @pl.when(k == pl.num_programs(1) - 1)
    def _():
        o_ref[...] = (acc_ref[...]
                      + b2_ref[...].astype(jnp.float32)).astype(o_ref.dtype)


# ----------------------------------------------------------------------------- wrapper
def mlp_forward(x, w1, b1, w2, b2, *, tm=512, th=1024, force_streaming=False):
    """x: [B, T, C]; w1: [C, 4C]; b1: [4C]; w2: [4C, C]; b2: [C] -> [B, T, C]

    Weights are stored as [in_features, out_features] (transposed vs. nn.Linear).
    tm: token tile (rows per MXU pass).  th: hidden chunk for the streamed fallback.
    """
    B, T, C = x.shape
    H = w1.shape[1]
    M = B * T

    tm = _pick_tm(M, tm)
    Mp = _round_up(M, tm)

    x_b = jnp.dtype(x.dtype).itemsize
    w_b = jnp.dtype(w1.dtype).itemsize
    out_b = x_b

    capacity = _vmem_capacity_bytes()
    budget = int(0.6 * capacity)            # headroom for compiler-internal scratch

    x2 = x.reshape(M, C)
    if Mp != M:
        # Correctness fallback for ragged token counts; _pick_tm avoids this when it can.
        x2 = jnp.pad(x2, ((0, Mp - M), (0, 0)))
    b1_2 = b1.reshape(1, H)
    b2_2 = b2.reshape(1, C)

    use_resident = (not force_streaming) and (
        _resident_vmem_bytes(tm, C, H, x_b, w_b, out_b) <= budget)

    if use_resident:
        est = _resident_vmem_bytes(tm, C, H, x_b, w_b, out_b)
        grid = (Mp // tm,)
        in_specs = [
            pl.BlockSpec((tm, C), lambda i: (i, 0)),  # x tile
            pl.BlockSpec((C, H), lambda i: (0, 0)),   # c_fc weight (resident)
            pl.BlockSpec((1, H), lambda i: (0, 0)),   # c_fc bias
            pl.BlockSpec((H, C), lambda i: (0, 0)),   # c_proj weight (resident)
            pl.BlockSpec((1, C), lambda i: (0, 0)),   # c_proj bias
        ]
        out_specs = pl.BlockSpec((tm, C), lambda i: (i, 0))
        scratch_shapes = []
        kernel = mlp_kernel_resident
        dim_sem = ("parallel",)
    else:
        # Hidden-dim streaming: th must divide H and be lane-aligned; shrink if the
        # chunked working set would still blow the budget.
        th = min(th, H)
        if H % th != 0 or (th % 128 != 0 and th != H):
            th = H
        while (th > 128 and th % 2 == 0 and (H % (th // 2) == 0)
               and _streamed_vmem_bytes(tm, th, C, H, x_b, w_b, out_b) > budget):
            th //= 2
        est = _streamed_vmem_bytes(tm, th, C, H, x_b, w_b, out_b)
        grid = (Mp // tm, H // th)
        in_specs = [
            pl.BlockSpec((tm, C), lambda i, k: (i, 0)),   # x tile
            pl.BlockSpec((C, th), lambda i, k: (0, k)),   # c_fc weight chunk
            pl.BlockSpec((1, th), lambda i, k: (0, k)),   # c_fc bias chunk
            pl.BlockSpec((th, C), lambda i, k: (k, 0)),   # c_proj weight chunk
            pl.BlockSpec((1, C), lambda i, k: (0, 0)),    # c_proj bias
        ]
        out_specs = pl.BlockSpec((tm, C), lambda i, k: (i, 0))
        scratch_shapes = [pltpu.VMEM((tm, C), jnp.float32)]
        kernel = mlp_kernel_streamed
        # H axis is a reduction into the resident output/acc -> keep it innermost
        # and "arbitrary"; M axis stays "parallel" for megacore sharding.
        dim_sem = ("parallel", "arbitrary")

    # Raise the scoped VMEM limit (v5e defaults to 16 MiB) but stay under physical.
    vmem_limit = int(min(max(1.4 * est, 32 << 20), 0.9 * capacity))

    out = pl.pallas_call(
        kernel,
        out_shape=jax.ShapeDtypeStruct((Mp, C), x.dtype),
        grid_spec=pltpu.PrefetchScalarGridSpec(
            num_scalar_prefetch=0,
            grid=grid,
            in_specs=in_specs,
            out_specs=out_specs,
            scratch_shapes=scratch_shapes,
        ),
        compiler_params=pltpu.CompilerParams(
            dimension_semantics=dim_sem,
            vmem_limit_bytes=vmem_limit),
    )(x2, w1, b1_2, w2, b2_2)

    if Mp != M:
        out = out[:M]
    return out.reshape(B, T, C)


def mlp_reference(x, w1, b1, w2, b2):
    xf = x.astype(jnp.float32)
    h = _gelu_tanh(jnp.dot(xf, w1.astype(jnp.float32)) + b1.astype(jnp.float32))
    return jnp.dot(h, w2.astype(jnp.float32)) + b2.astype(jnp.float32)


if __name__ == "__main__":
    # Small shapes consistent with the module: n_embd=C, hidden=4*C.
    B, T, C = 2, 8, 128
    H = 4 * C

    key = jax.random.PRNGKey(0)
    kx, k1, k2, k3, k4 = jax.random.split(key, 5)

    x = jax.random.normal(kx, (B, T, C), dtype=jnp.float32)

    # Deterministic init mirroring nn.Linear default (uniform +-1/sqrt(fan_in)).
    bound1 = 1.0 / math.sqrt(C)
    w1 = jax.random.uniform(k1, (C, H), minval=-bound1, maxval=bound1, dtype=jnp.float32)
    b1 = jax.random.uniform(k2, (H,), minval=-bound1, maxval=bound1, dtype=jnp.float32)
    bound2 = 1.0 / math.sqrt(H)
    w2 = jax.random.uniform(k3, (H, C), minval=-bound2, maxval=bound2, dtype=jnp.float32)
    b2 = jax.random.uniform(k4, (C,), minval=-bound2, maxval=bound2, dtype=jnp.float32)

    y_ref = mlp_reference(x, w1, b1, w2, b2)

    # f32 run, weight-resident path (weights fit VMEM at these shapes).
    y = mlp_forward(x, w1, b1, w2, b2)
    jax.block_until_ready(y)
    assert y.shape == (B, T, C)
    assert jnp.allclose(y, y_ref, atol=2e-3, rtol=2e-3)

    # f32 run, forced H-streaming fallback (exercises the accumulator path).
    y_s = mlp_forward(x, w1, b1, w2, b2, th=256, force_streaming=True)
    jax.block_until_ready(y_s)
    assert jnp.allclose(y_s, y_ref, atol=2e-3, rtol=2e-3)

    # bf16 run: native-dtype MXU operands with f32 accumulation (looser tolerance).
    y_bf16 = mlp_forward(x.astype(jnp.bfloat16),
                         w1.astype(jnp.bfloat16), b1.astype(jnp.bfloat16),
                         w2.astype(jnp.bfloat16), b2.astype(jnp.bfloat16))
    jax.block_until_ready(y_bf16)
    assert y_bf16.shape == (B, T, C)
    assert jnp.allclose(y_bf16.astype(jnp.float32), y_ref, atol=5e-2, rtol=5e-2)

    print("KERNEL_OK")
</pallas_src>

<mosaic_0001>
module attributes {stable_mosaic.version = 11 : i64} {
  func.func @mlp_kernel_resident(%arg0: i32, %arg1: memref<16x128xf32, #tpu.memory_space<vmem>>, %arg2: memref<128x512xf32, #tpu.memory_space<vmem>>, %arg3: memref<1x512xf32, #tpu.memory_space<vmem>>, %arg4: memref<512x128xf32, #tpu.memory_space<vmem>>, %arg5: memref<1x128xf32, #tpu.memory_space<vmem>>, %arg6: memref<16x128xf32, #tpu.memory_space<vmem>>) attributes {dimension_semantics = [#tpu.dimension_semantics<parallel>], iteration_bounds = array<i64: 1>, scalar_prefetch = 0 : i64, scratch_operands = 0 : i64, tpu.core_type = #tpu.core_type<tc>, window_params = [{transform_indices = @transform_0, window_bounds = array<i64: 16, 128>}, {pipeline_mode = #tpu.pipeline_mode<synchronous>, transform_indices = @transform_1, window_bounds = array<i64: 128, 512>}, {pipeline_mode = #tpu.pipeline_mode<synchronous>, transform_indices = @transform_2, window_bounds = array<i64: 1, 512>}, {pipeline_mode = #tpu.pipeline_mode<synchronous>, transform_indices = @transform_3, window_bounds = array<i64: 512, 128>}, {pipeline_mode = #tpu.pipeline_mode<synchronous>, transform_indices = @transform_4, window_bounds = array<i64: 1, 128>}, {transform_indices = @transform_5, window_bounds = array<i64: 16, 128>}]} {
    %c0 = arith.constant 0 : index
    %c0_0 = arith.constant 0 : index
    %0 = vector.load %arg1[%c0, %c0_0] : memref<16x128xf32, #tpu.memory_space<vmem>>, vector<16x128xf32>
    %c0_1 = arith.constant 0 : index
    %c0_2 = arith.constant 0 : index
    %1 = vector.load %arg2[%c0_1, %c0_2] : memref<128x512xf32, #tpu.memory_space<vmem>>, vector<128x512xf32>
    %cst = arith.constant dense<0.000000e+00> : vector<16x512xf32>
    %2 = tpu.matmul %0, %1, %cst {dimension_numbers = #tpu.dot_dimension_numbers<[1], [0], [0], [1], [0, 0, 1, 1], [], []>} : vector<16x128xf32>, vector<128x512xf32>, vector<16x512xf32> -> vector<16x512xf32>
    %c0_3 = arith.constant 0 : index
    %c0_4 = arith.constant 0 : index
    %3 = vector.load %arg3[%c0_3, %c0_4] : memref<1x512xf32, #tpu.memory_space<vmem>>, vector<1x512xf32>
    %4 = vector.broadcast %3 : vector<1x512xf32> to vector<16x512xf32>
    %5 = arith.addf %2, %4 : vector<16x512xf32>
    %cst_5 = arith.constant 5.000000e-01 : f32
    %6 = vector.broadcast %cst_5 : f32 to vector<16x512xf32>
    %7 = arith.mulf %6, %5 : vector<16x512xf32>
    %cst_6 = arith.constant 4.471500e-02 : f32
    %8 = vector.broadcast %cst_6 : f32 to vector<16x512xf32>
    %9 = arith.mulf %8, %5 : vector<16x512xf32>
    %10 = arith.mulf %9, %5 : vector<16x512xf32>
    %11 = arith.mulf %10, %5 : vector<16x512xf32>
    %12 = arith.addf %5, %11 : vector<16x512xf32>
    %cst_7 = arith.constant 0.797884583 : f32
    %13 = vector.broadcast %cst_7 : f32 to vector<16x512xf32>
    %14 = arith.mulf %13, %12 : vector<16x512xf32>
    %15 = math.tanh %14 : vector<16x512xf32>
    %cst_8 = arith.constant 1.000000e+00 : f32
    %16 = vector.broadcast %cst_8 : f32 to vector<16x512xf32>
    %17 = arith.addf %16, %15 : vector<16x512xf32>
    %18 = arith.mulf %7, %17 : vector<16x512xf32>
    %c0_9 = arith.constant 0 : index
    %c0_10 = arith.constant 0 : index
    %19 = vector.load %arg4[%c0_9, %c0_10] : memref<512x128xf32, #tpu.memory_space<vmem>>, vector<512x128xf32>
    %cst_11 = arith.constant dense<0.000000e+00> : vector<16x128xf32>
    %20 = tpu.matmul %18, %19, %cst_11 {dimension_numbers = #tpu.dot_dimension_numbers<[1], [0], [0], [1], [0, 0, 1, 1], [], []>} : vector<16x512xf32>, vector<512x128xf32>, vector<16x128xf32> -> vector<16x128xf32>
    %c0_12 = arith.constant 0 : index
    %c0_13 = arith.constant 0 : index
    %21 = vector.load %arg5[%c0_12, %c0_13] : memref<1x128xf32, #tpu.memory_space<vmem>>, vector<1x128xf32>
    %22 = vector.broadcast %21 : vector<1x128xf32> to vector<16x128xf32>
    %23 = arith.addf %20, %22 : vector<16x128xf32>
    %c0_14 = arith.constant 0 : index
    %c0_15 = arith.constant 0 : index
    %24 = vector.load %arg6[%c0_14, %c0_15] : memref<16x128xf32, #tpu.memory_space<vmem>>, vector<16x128xf32>
    tpu.vector_store %arg6[%c0_14, %c0_15], %23 {strides = array<i32>} : memref<16x128xf32, #tpu.memory_space<vmem>>, vector<16x128xf32>,
    return
  }
  func.func @transform_0(%arg0: i32) -> (i32, i32) {
    %c0_i32 = arith.constant 0 : i32
    %c0_i32_0 = arith.constant 0 : i32
    return %arg0, %c0_i32 : i32, i32
  }
  func.func @transform_1(%arg0: i32) -> (i32, i32) {
    %c0_i32 = arith.constant 0 : i32
    %c0_i32_0 = arith.constant 0 : i32
    %c0_i32_1 = arith.constant 0 : i32
    return %c0_i32, %c0_i32_0 : i32, i32
  }
  func.func @transform_2(%arg0: i32) -> (i32, i32) {
    %c0_i32 = arith.constant 0 : i32
    %c0_i32_0 = arith.constant 0 : i32
    %c0_i32_1 = arith.constant 0 : i32
    return %c0_i32, %c0_i32_0 : i32, i32
  }
  func.func @transform_3(%arg0: i32) -> (i32, i32) {
    %c0_i32 = arith.constant 0 : i32
    %c0_i32_0 = arith.constant 0 : i32
    %c0_i32_1 = arith.constant 0 : i32
    return %c0_i32, %c0_i32_0 : i32, i32
  }
  func.func @transform_4(%arg0: i32) -> (i32, i32) {
    %c0_i32 = arith.constant 0 : i32
    %c0_i32_0 = arith.constant 0 : i32
    %c0_i32_1 = arith.constant 0 : i32
    return %c0_i32, %c0_i32_0 : i32, i32
  }
  func.func @transform_5(%arg0: i32) -> (i32, i32) {
    %c0_i32 = arith.constant 0 : i32
    %c0_i32_0 = arith.constant 0 : i32
    return %arg0, %c0_i32 : i32, i32
  }
}

</mosaic_0001>

<bundles_post_ra>
// kernel: tpu_custom_call.1
= control target key start
LH: loop header
LB: loop body
LE: loop exit
PB: predicated region body
PF: predicated region fallthrough
CT: control target
= control target key end

     0   :  { %10 = vsyncpa [#allocation3], 0  ;;  %s739_s0 = inlined_call_operand.hbm [shape: f32[16,128], index: 0, kind: input, shape index: {}]   ;;  %s740_s1 = inlined_call_operand.hbm [shape: f32[128,512], index: 1, kind: input, shape index: {}]   ;;  %s741_s2 = inlined_call_operand.hbm [shape: f32[1,512], index: 2, kind: input, shape index: {}]   ;;  %s742_s3 = inlined_call_operand.hbm [shape: f32[512,128], index: 3, kind: input, shape index: {}]   ;;  %s743_s4 = inlined_call_operand.vmem [shape: f32[1,128], index: 4, kind: input, shape index: {}]   ;;  %s744_s5 = inlined_call_operand.hbm [shape: f32[16,128], index: 5, kind: output, shape index: {}]  }
   0x1   :  { %11 = vsyncpa [#allocation6], 0 }
   0x2   :  { %12 = vsyncpa [#allocation9], 0  ;;  %s31_s20 = sshll.u32 %s740_s1, 4  ;;  %s32_s20 = int_to_ptr.hbm [resolvable:$true] %s31_s20 }
   0x3   :  { %13 = vsyncpa [#allocation4], 0  ;;  %s659_s21 = smov [#allocation5]   ;;  %s18_s25 = sshll.u32 %s739_s0, 4  ;;  %s19_s25 = int_to_ptr.hbm [resolvable:$true] %s18_s25 }
   0x4   :  { %s33_s22 = sshll.u32 %s659_s21, 4  ;;  %s660_s26 = smov 512   ;;  %s34_s22 = int_to_ptr.vmem [resolvable:$true] %s33_s22 }
   0x5   :  { %s661_s27 = smov 32   ;;  %s662_s28 = smov [#allocation2]  }
   0x6   :  { %39 = dma.hbm_to_vmem [thread:$0]  %s32_s20, 8192, %s34_s22, [#allocation6], %s660_s26, %s660_s26, %s661_s27  }
   0x7   :  { %s20_s29 = sshll.u32 %s662_s28, 4  ;;  %s663_s30 = smov 128   ;;  %s21_s29 = int_to_ptr.vmem [resolvable:$true] %s20_s29 }
   0x8   :  { %s664_s6 = smov 8   ;;  %s45_s8 = sshll.u32 %s741_s2, 4  ;;  %s46_s8 = int_to_ptr.hbm [resolvable:$true] %s45_s8 }
   0x9   :  { %26 = dma.hbm_to_vmem [thread:$0]  %s19_s25, 256, %s21_s29, [#allocation3], %s663_s30, %s663_s30, %s664_s6  }
   0xa   :  { %s665_s9 = smov [#allocation7]   ;;  %s55_s12 = sshll.u32 %s742_s3, 4  ;;  %s56_s12 = int_to_ptr.hbm [resolvable:$true] %s55_s12 }
   0xb   :  { %s47_s0 = sshll.u32 %s665_s9, 4  ;;  %s666_s13 = smov [#allocation8]   ;;  %s48_s0 = int_to_ptr.vmem [resolvable:$true] %s47_s0 }
   0xc   :  { %50 = dma.hbm_to_vmem [thread:$0]  %s46_s8, 64, %s48_s0, [#allocation6]  }
   0xd   :  { %s57_s14 = sshll.u32 %s666_s13, 4  ;;  %s58_s14 = int_to_ptr.vmem [resolvable:$true] %s57_s14 }
   0xe   :  { %63 = dma.hbm_to_vmem [thread:$0]  %s56_s12, 8192, %s58_s14, [#allocation9], %s663_s30, %s663_s30, %s664_s6  }
   0xf   :  { %651 = dma.done.wait [#allocation3], 256  }
  0x10   :  { %652 = vsyncadd [#allocation3], 4294967040 }
  0x11   :  { %653 = dma.done.wait [#allocation6], 8256  }
  0x12   :  { %654 = vsyncadd [#allocation6], 4294959040 }
  0x13   :  { %655 = dma.done.wait [#allocation9], 8192  }
  0x14   :  { %656 = vsyncadd [#allocation9], 4294959104  ;;  %v144_v0 = vld [vmem:[#allocation5 + $0x1e0] sm:$0xff]  ;;  %v145_v1 = vld [vmem:[#allocation5 + $0x1e8] sm:$0xff]  ;;  %s667_s15 = smov [#allocation10]  }
  0x15   :  { %v146_v2 = vld [vmem:[#allocation5 + $0x1f0] sm:$0xff]  ;;  %158 = vmatpush.msra.mxu0 %v144_v0  ;;  %181 = vmatpush.msra.mxu1 %v145_v1  ;;  %v147_v3 = vld [vmem:[#allocation5 + $0x1f8] sm:$0xff]  ;;  %v140_v4 = vld [vmem:[#allocation5 + $0x1c0] sm:$0xff]  ;;  %s488_s16 = sshll.u32 %s667_s15, 4  ;;  %s489_s16 = int_to_ptr.vmem [resolvable:$true] %s488_s16 }
  0x16   :  { %v141_v5 = vld [vmem:[#allocation5 + $0x1c8] sm:$0xff]  ;;  %204 = vmatpush.msra.mxu2 %v146_v2  ;;  %227 = vmatpush.msra.mxu3 %v147_v3  ;;  %v142_v6 = vld [vmem:[#allocation5 + $0x1d0] sm:$0xff]  ;;  %v143_v7 = vld [vmem:[#allocation5 + $0x1d8] sm:$0xff] }
  0x17   :  { %v136_v8 = vld [vmem:[#allocation5 + $0x1a0] sm:$0xff]  ;;  %159 = vmatpush.msra.mxu0 %v140_v4  ;;  %182 = vmatpush.msra.mxu1 %v141_v5  ;;  %v137_v9 = vld [vmem:[#allocation5 + $0x1a8] sm:$0xff]  ;;  %v138_v10 = vld [vmem:[#allocation5 + $0x1b0] sm:$0xff] }
  0x18   :  { %v139_v11 = vld [vmem:[#allocation5 + $0x1b8] sm:$0xff]  ;;  %205 = vmatpush.msra.mxu2 %v142_v6  ;;  %228 = vmatpush.msra.mxu3 %v143_v7  ;;  %v132_v12 = vld [vmem:[#allocation5 + $0x180] sm:$0xff]  ;;  %v133_v13 = vld [vmem:[#allocation5 + $0x188] sm:$0xff] }
  0x19   :  { %160 = vmatpush.msra.mxu0 %v136_v8  ;;  %183 = vmatpush.msra.mxu1 %v137_v9  ;;  %v134_v14 = vld [vmem:[#allocation5 + $0x190] sm:$0xff]  ;;  %v135_v15 = vld [vmem:[#allocation5 + $0x198] sm:$0xff]  ;;  %v128_v16 = vld [vmem:[#allocation5 + $0x160] sm:$0xff] }
  0x1a   :  { %206 = vmatpush.msra.mxu2 %v138_v10  ;;  %229 = vmatpush.msra.mxu3 %v139_v11  ;;  %v129_v17 = vld [vmem:[#allocation5 + $0x168] sm:$0xff]  ;;  %v130_v18 = vld [vmem:[#allocation5 + $0x170] sm:$0xff]  ;;  %v131_v19 = vld [vmem:[#allocation5 + $0x178] sm:$0xff] }
  0x1b   :  { %161 = vmatpush.msra.mxu0 %v132_v12  ;;  %184 = vmatpush.msra.mxu1 %v133_v13  ;;  %v124_v20 = vld [vmem:[#allocation5 + $0x140] sm:$0xff]  ;;  %v125_v21 = vld [vmem:[#allocation5 + $0x148] sm:$0xff]  ;;  %v126_v22 = vld [vmem:[#allocation5 + $0x150] sm:$0xff] }
  0x1c   :  { %207 = vmatpush.msra.mxu2 %v134_v14  ;;  %230 = vmatpush.msra.mxu3 %v135_v15  ;;  %v127_v23 = vld [vmem:[#allocation5 + $0x158] sm:$0xff]  ;;  %v120_v24 = vld [vmem:[#allocation5 + $0x120] sm:$0xff]  ;;  %v121_v25 = vld [vmem:[#allocation5 + $0x128] sm:$0xff] }
  0x1d   :  { %162 = vmatpush.msra.mxu0 %v128_v16  ;;  %185 = vmatpush.msra.mxu1 %v129_v17  ;;  %v122_v26 = vld [vmem:[#allocation5 + $0x130] sm:$0xff]  ;;  %v123_v27 = vld [vmem:[#allocation5 + $0x138] sm:$0xff]  ;;  %v116_v28 = vld [vmem:[#allocation5 + $0x100] sm:$0xff] }
  0x1e   :  { %208 = vmatpush.msra.mxu2 %v130_v18  ;;  %231 = vmatpush.msra.mxu3 %v131_v19  ;;  %v117_v29 = vld [vmem:[#allocation5 + $0x108] sm:$0xff]  ;;  %v118_v30 = vld [vmem:[#allocation5 + $0x110] sm:$0xff]  ;;  %v119_v31 = vld [vmem:[#allocation5 + $0x118] sm:$0xff] }
  0x1f   :  { %163 = vmatpush.msra.mxu0 %v124_v20  ;;  %186 = vmatpush.msra.mxu1 %v125_v21  ;;  %v112_v32 = vld [vmem:[#allocation5 + $0xe0] sm:$0xff]  ;;  %v113_v33 = vld [vmem:[#allocation5 + $0xe8] sm:$0xff]  ;;  %v114_v34 = vld [vmem:[#allocation5 + $0xf0] sm:$0xff] }
  0x20   :  { %209 = vmatpush.msra.mxu2 %v126_v22  ;;  %232 = vmatpush.msra.mxu3 %v127_v23  ;;  %v115_v35 = vld [vmem:[#allocation5 + $0xf8] sm:$0xff]  ;;  %v108_v36 = vld [vmem:[#allocation5 + $0xc0] sm:$0xff]  ;;  %v109_v37 = vld [vmem:[#allocation5 + $0xc8] sm:$0xff] }
  0x21   :  { %164 = vmatpush.msra.mxu0 %v120_v24  ;;  %187 = vmatpush.msra.mxu1 %v121_v25  ;;  %v110_v38 = vld [vmem:[#allocation5 + $0xd0] sm:$0xff]  ;;  %v111_v39 = vld [vmem:[#allocation5 + $0xd8] sm:$0xff]  ;;  %v104_v40 = vld [vmem:[#allocation5 + $0xa0] sm:$0xff] }
  0x22   :  { %210 = vmatpush.msra.mxu2 %v122_v26  ;;  %233 = vmatpush.msra.mxu3 %v123_v27  ;;  %v105_v41 = vld [vmem:[#allocation5 + $0xa8] sm:$0xff]  ;;  %v106_v42 = vld [vmem:[#allocation5 + $0xb0] sm:$0xff]  ;;  %v107_v43 = vld [vmem:[#allocation5 + $0xb8] sm:$0xff] }
  0x23   :  { %165 = vmatpush.msra.mxu0 %v116_v28  ;;  %188 = vmatpush.msra.mxu1 %v117_v29  ;;  %v100_v44 = vld [vmem:[#allocation5 + $0x80] sm:$0xff]  ;;  %v101_v45 = vld [vmem:[#allocation5 + $0x88] sm:$0xff]  ;;  %v102_v46 = vld [vmem:[#allocation5 + $0x90] sm:$0xff] }
  0x24   :  { %211 = vmatpush.msra.mxu2 %v118_v30  ;;  %234 = vmatpush.msra.mxu3 %v119_v31  ;;  %v103_v47 = vld [vmem:[#allocation5 + $0x98] sm:$0xff]  ;;  %v96_v48 = vld [vmem:[#allocation5 + $0x60] sm:$0xff]  ;;  %v97_v49 = vld [vmem:[#allocation5 + $0x68] sm:$0xff] }
  0x25   :  { %166 = vmatpush.msra.mxu0 %v112_v32  ;;  %189 = vmatpush.msra.mxu1 %v113_v33  ;;  %v98_v50 = vld [vmem:[#allocation5 + $0x70] sm:$0xff]  ;;  %v99_v51 = vld [vmem:[#allocation5 + $0x78] sm:$0xff]  ;;  %v92_v52 = vld [vmem:[#allocation5 + $0x40] sm:$0xff] }
  0x26   :  { %212 = vmatpush.msra.mxu2 %v114_v34  ;;  %235 = vmatpush.msra.mxu3 %v115_v35  ;;  %v93_v53 = vld [vmem:[#allocation5 + $0x48] sm:$0xff]  ;;  %v94_v54 = vld [vmem:[#allocation5 + $0x50] sm:$0xff]  ;;  %v95_v55 = vld [vmem:[#allocation5 + $0x58] sm:$0xff] }
  0x27   :  { %167 = vmatpush.msra.mxu0 %v108_v36  ;;  %190 = vmatpush.msra.mxu1 %v109_v37  ;;  %v88_v56 = vld [vmem:[#allocation5 + $0x20] sm:$0xff]  ;;  %v89_v57 = vld [vmem:[#allocation5 + $0x28] sm:$0xff]  ;;  %v90_v58 = vld [vmem:[#allocation5 + $0x30] sm:$0xff] }
  0x28   :  { %213 = vmatpush.msra.mxu2 %v110_v38  ;;  %236 = vmatpush.msra.mxu3 %v111_v39  ;;  %v91_v59 = vld [vmem:[#allocation5 + $0x38] sm:$0xff]  ;;  %v84_v60 = vld [vmem:[#allocation5] sm:$0xff]  ;;  %v85_v61 = vld [vmem:[#allocation5 + $0x8] sm:$0xff] }
  0x29   :  { %168 = vmatpush.msra.mxu0 %v104_v40  ;;  %191 = vmatpush.msra.mxu1 %v105_v41  ;;  %v86_v62 = vld [vmem:[#allocation5 + $0x10] sm:$0xff]  ;;  %v87_v63 = vld [vmem:[#allocation5 + $0x18] sm:$0xff]  ;;  %v334_v10 = vld [vmem:[#allocation8 + $0x60] sm:$0xff] }
  0x2a   :  { %214 = vmatpush.msra.mxu2 %v106_v42  ;;  %237 = vmatpush.msra.mxu3 %v107_v43  ;;  %v82_v0 = vld [vmem:[#allocation2] sm:$0xff]  ;;  %v337_v1 = vld [vmem:[#allocation8 + $0x78] sm:$0xff]  ;;  %v350_v11 = vld [vmem:[#allocation8 + $0xe0] sm:$0xff] }
  0x2b   :  { %169 = vmatpush.msra.mxu0 %v100_v44  ;;  %192 = vmatpush.msra.mxu1 %v101_v45  ;;  %v353_v2 = vld [vmem:[#allocation8 + $0xf8] sm:$0xff]  ;;  %v336_v5 = vld [vmem:[#allocation8 + $0x70] sm:$0xff]  ;;  %v335_v7 = vld [vmem:[#allocation8 + $0x68] sm:$0xff] }
  0x2c   :  { %215 = vmatpush.msra.mxu2 %v102_v46  ;;  %238 = vmatpush.msra.mxu3 %v103_v47  ;;  %v369_v3 = vld [vmem:[#allocation8 + $0x178] sm:$0xff]  ;;  %v352_v6 = vld [vmem:[#allocation8 + $0xf0] sm:$0xff]  ;;  %v351_v8 = vld [vmem:[#allocation8 + $0xe8] sm:$0xff] }
  0x2d   :  { %170 = vmatpush.msra.mxu0 %v96_v48  ;;  %193 = vmatpush.msra.mxu1 %v97_v49  ;;  %v385_v4 = vld [vmem:[#allocation8 + $0x1f8] sm:$0xff]  ;;  %v368_v14 = vld [vmem:[#allocation8 + $0x170] sm:$0xff]  ;;  %v367_v18 = vld [vmem:[#allocation8 + $0x168] sm:$0xff] }
  0x2e   :  { %216 = vmatpush.msra.mxu2 %v98_v50  ;;  %239 = vmatpush.msra.mxu3 %v99_v51  ;;  %v83_v9 = vld [vmem:[#allocation2 + $0x8] sm:$0xff]  ;;  %v383_v19 = vld [vmem:[#allocation8 + $0x1e8] sm:$0xff]  ;;  %v366_v22 = vld [vmem:[#allocation8 + $0x160] sm:$0xff] }
  0x2f   :  { %171 = vmatpush.msra.mxu0 %v92_v52  ;;  %194 = vmatpush.msra.mxu1 %v93_v53  ;;  %v333_v12 = vld [vmem:[#allocation8 + $0x58] sm:$0xff]  ;;  %v384_v15 = vld [vmem:[#allocation8 + $0x1f0] sm:$0xff]  ;;  %v331_v20 = vld [vmem:[#allocation8 + $0x48] sm:$0xff] }
  0x30   :  { %217 = vmatpush.msra.mxu2 %v94_v54  ;;  %240 = vmatpush.msra.mxu3 %v95_v55  ;;  %v349_v13 = vld [vmem:[#allocation8 + $0xd8] sm:$0xff]  ;;  %v332_v16 = vld [vmem:[#allocation8 + $0x50] sm:$0xff]  ;;  %v347_v21 = vld [vmem:[#allocation8 + $0xc8] sm:$0xff] }
  0x31   :  { %172 = vmatpush.msra.mxu0 %v88_v56  ;;  %195 = vmatpush.msra.mxu1 %v89_v57  ;;  %v348_v17 = vld [vmem:[#allocation8 + $0xd0] sm:$0xff]  ;;  %v382_v23 = vld [vmem:[#allocation8 + $0x1e0] sm:$0xff]  ;;  %v365_v26 = vld [vmem:[#allocation8 + $0x158] sm:$0xff] }
  0x32   :  { %218 = vmatpush.msra.mxu2 %v90_v58  ;;  %241 = vmatpush.msra.mxu3 %v91_v59  ;;  %v330_v24 = vld [vmem:[#allocation8 + $0x40] sm:$0xff]  ;;  %v381_v27 = vld [vmem:[#allocation8 + $0x1d8] sm:$0xff]  ;;  %v364_v30 = vld [vmem:[#allocation8 + $0x150] sm:$0xff] }
  0x33   :  { %173 = vmatpush.msra.mxu0 %v84_v60  ;;  %196 = vmatpush.msra.mxu1 %v85_v61  ;;  %v346_v25 = vld [vmem:[#allocation8 + $0xc0] sm:$0xff]  ;;  %v329_v28 = vld [vmem:[#allocation8 + $0x38] sm:$0xff]  ;;  %v380_v31 = vld [vmem:[#allocation8 + $0x1d0] sm:$0xff] }
  0x34   :  { %219 = vmatpush.msra.mxu2 %v86_v62  ;;  %242 = vmatpush.msra.mxu3 %v87_v63  ;;  %v345_v29 = vld [vmem:[#allocation8 + $0xb8] sm:$0xff]  ;;  %v328_v32 = vld [vmem:[#allocation8 + $0x30] sm:$0xff]  ;;  %v363_v34 = vld [vmem:[#allocation8 + $0x148] sm:$0xff] }
  0x35   :  { %174 = vmatmul.f32.vlgmr.msra.gmra.mxu0 %v82_v0  ;;  %197 = vmatmul.f32.vlgmr.msra.gmra.mxu1 %v82_v0  ;;  %v344_v33 = vld [vmem:[#allocation8 + $0xb0] sm:$0xff]  ;;  %v379_v35 = vld [vmem:[#allocation8 + $0x1c8] sm:$0xff]  ;;  %v362_v38 = vld [vmem:[#allocation8 + $0x140] sm:$0xff] }
  0x36   :  { %220 = vmatmul.f32.vlgmr.msra.gmra.mxu2 %v82_v0  ;;  %243 = vmatmul.f32.vlgmr.msra.gmra.mxu3 %v82_v0  ;;  %v327_v36 = vld [vmem:[#allocation8 + $0x28] sm:$0xff]  ;;  %v378_v39 = vld [vmem:[#allocation8 + $0x1c0] sm:$0xff]  ;;  %v361_v42 = vld [vmem:[#allocation8 + $0x138] sm:$0xff] }
  0x37   :  { %390 = vmatpush.msrb.mxu0 %v337_v1  ;;  %413 = vmatpush.msrb.mxu1 %v353_v2  ;;  %v343_v37 = vld [vmem:[#allocation8 + $0xa8] sm:$0xff]  ;;  %v326_v40 = vld [vmem:[#allocation8 + $0x20] sm:$0xff]  ;;  %v377_v43 = vld [vmem:[#allocation8 + $0x1b8] sm:$0xff] }
  0x38   :  { %436 = vmatpush.msrb.mxu2 %v369_v3  ;;  %459 = vmatpush.msrb.mxu3 %v385_v4  ;;  %v342_v41 = vld [vmem:[#allocation8 + $0xa0] sm:$0xff]  ;;  %v325_v44 = vld [vmem:[#allocation8 + $0x18] sm:$0xff]  ;;  %v360_v46 = vld [vmem:[#allocation8 + $0x130] sm:$0xff] }
  0x39   :  { %391 = vmatpush.msrb.mxu0 %v336_v5  ;;  %414 = vmatpush.msrb.mxu1 %v352_v6  ;;  %v341_v45 = vld [vmem:[#allocation8 + $0x98] sm:$0xff]  ;;  %v376_v47 = vld [vmem:[#allocation8 + $0x1b0] sm:$0xff]  ;;  %v359_v50 = vld [vmem:[#allocation8 + $0x128] sm:$0xff] }
  0x3a   :  { %437 = vmatpush.msrb.mxu2 %v368_v14  ;;  %460 = vmatpush.msrb.mxu3 %v384_v15  ;;  %v324_v48 = vld [vmem:[#allocation8 + $0x10] sm:$0xff]  ;;  %v375_v51 = vld [vmem:[#allocation8 + $0x1a8] sm:$0xff]  ;;  %v358_v54 = vld [vmem:[#allocation8 + $0x120] sm:$0xff] }
  0x3b   :  { %392 = vmatpush.msrb.mxu0 %v335_v7  ;;  %415 = vmatpush.msrb.mxu1 %v351_v8  ;;  %v340_v49 = vld [vmem:[#allocation8 + $0x90] sm:$0xff]  ;;  %v323_v52 = vld [vmem:[#allocation8 + $0x8] sm:$0xff]  ;;  %v374_v55 = vld [vmem:[#allocation8 + $0x1a0] sm:$0xff] }
  0x3c   :  { %438 = vmatpush.msrb.mxu2 %v367_v18  ;;  %461 = vmatpush.msrb.mxu3 %v383_v19  ;;  %v339_v53 = vld [vmem:[#allocation8 + $0x88] sm:$0xff]  ;;  %v322_v56 = vld [vmem:[#allocation8] sm:$0xff]  ;;  %v357_v58 = vld [vmem:[#allocation8 + $0x118] sm:$0xff] }
  0x3d   :  { %177 = vmatmul.f32.gmra.mxu0 %v83_v9  ;;  %200 = vmatmul.f32.gmra.mxu1 %v83_v9  ;;  %v338_v57 = vld [vmem:[#allocation8 + $0x80] sm:$0xff]  ;;  %v373_v59 = vld [vmem:[#allocation8 + $0x198] sm:$0xff]  ;;  %v356_v60 = vld [vmem:[#allocation8 + $0x110] sm:$0xff] }
  0x3e   :  { %223 = vmatmul.f32.gmra.mxu2 %v83_v9  ;;  %246 = vmatmul.f32.gmra.mxu3 %v83_v9  ;;  %v372_v61 = vld [vmem:[#allocation8 + $0x190] sm:$0xff]  ;;  %v148_v62 = vld [vmem:[#allocation7] sm:$0xf]  ;;  %v355_v63 = vld [vmem:[#allocation8 + $0x108] sm:$0xff] }
  0x3f   :  { %393 = vmatpush.msrb.mxu0 %v334_v10  ;;  %416 = vmatpush.msrb.mxu1 %v350_v11  ;;  %v371_v0 = vld [vmem:[#allocation8 + $0x188] sm:$0xff]  ;;  %v354_v1 = vld [vmem:[#allocation8 + $0x100] sm:$0xff]  ;;  %v150_v3 = vperm.slane %v148_v62, 0  ;;  %v151_v4 = vperm.slane %v148_v62, 1  ;;  %v152_v11 = vperm.slane %v148_v62, 2 }
  0x40   :  { %439 = vmatpush.msrb.mxu2 %v366_v22  ;;  %462 = vmatpush.msrb.mxu3 %v382_v23  ;;  %v370_v2 = vld [vmem:[#allocation8 + $0x180] sm:$0xff] }
  0x41   :  { %394 = vmatpush.msrb.mxu0 %v333_v12  ;;  %417 = vmatpush.msrb.mxu1 %v349_v13  ;;  %v153_v12 = vperm.slane %v148_v62, 3 }
  0x42   :  { %440 = vmatpush.msrb.mxu2 %v365_v26  ;;  %463 = vmatpush.msrb.mxu3 %v381_v27 }
  0x43   :  { %395 = vmatpush.msrb.mxu0 %v332_v16  ;;  %418 = vmatpush.msrb.mxu1 %v348_v17 }
  0x44   :  { %441 = vmatpush.msrb.mxu2 %v364_v30  ;;  %464 = vmatpush.msrb.mxu3 %v380_v31 }
  0x45   :  { %396 = vmatpush.msrb.mxu0 %v331_v20  ;;  %419 = vmatpush.msrb.mxu1 %v347_v21 }
  0x46   :  { %442 = vmatpush.msrb.mxu2 %v363_v34  ;;  %465 = vmatpush.msrb.mxu3 %v379_v35 }
  0x47   :  { %397 = vmatpush.msrb.mxu0 %v330_v24  ;;  %420 = vmatpush.msrb.mxu1 %v346_v25 }
  0x48   :  { %443 = vmatpush.msrb.mxu2 %v362_v38  ;;  %466 = vmatpush.msrb.mxu3 %v378_v39 }
  0x49   :  { %398 = vmatpush.msrb.mxu0 %v329_v28  ;;  %421 = vmatpush.msrb.mxu1 %v345_v29 }
  0x4a   :  { %444 = vmatpush.msrb.mxu2 %v361_v42  ;;  %467 = vmatpush.msrb.mxu3 %v377_v43 }
  0x4b   :  { %399 = vmatpush.msrb.mxu0 %v328_v32  ;;  %422 = vmatpush.msrb.mxu1 %v344_v33 }
  0x4c   :  { %445 = vmatpush.msrb.mxu2 %v360_v46  ;;  %468 = vmatpush.msrb.mxu3 %v376_v47 }
  0x4d   :  { %400 = vmatpush.msrb.mxu0 %v327_v36  ;;  %423 = vmatpush.msrb.mxu1 %v343_v37 }
  0x4e   :  { %446 = vmatpush.msrb.mxu2 %v359_v50  ;;  %469 = vmatpush.msrb.mxu3 %v375_v51 }
  0x4f   :  { %401 = vmatpush.msrb.mxu0 %v326_v40  ;;  %424 = vmatpush.msrb.mxu1 %v342_v41 }
  0x50   :  { %447 = vmatpush.msrb.mxu2 %v358_v54  ;;  %470 = vmatpush.msrb.mxu3 %v374_v55 }
  0x51   :  { %402 = vmatpush.msrb.mxu0 %v325_v44  ;;  %425 = vmatpush.msrb.mxu1 %v341_v45 }
  0x52   :  { %448 = vmatpush.msrb.mxu2 %v357_v58  ;;  %471 = vmatpush.msrb.mxu3 %v373_v59 }
  0x53   :  { %403 = vmatpush.msrb.mxu0 %v324_v48  ;;  %426 = vmatpush.msrb.mxu1 %v340_v49 }
  0x54   :  { %449 = vmatpush.msrb.mxu2 %v356_v60  ;;  %472 = vmatpush.msrb.mxu3 %v372_v61 }
  0x55   :  { %404 = vmatpush.msrb.mxu0 %v323_v52  ;;  %427 = vmatpush.msrb.mxu1 %v339_v53 }
  0x56   :  { %450 = vmatpush.msrb.mxu2 %v355_v63  ;;  %473 = vmatpush.msrb.mxu3 %v371_v0 }
  0x57   :  { %405 = vmatpush.msrb.mxu0 %v322_v56  ;;  %428 = vmatpush.msrb.mxu1 %v338_v57 }
  0x58   :  { %451 = vmatpush.msrb.mxu2 %v354_v1  ;;  %474 = vmatpush.msrb.mxu3 %v370_v2 }
  0xb2   :  { %v175_v5 = vpop.f32.mrf.mxu0  ;;  %v198_v6 = vpop.f32.mrf.mxu1 }
  0xb3   :  { %v176_v7 = vadd.f32 %v175_v5, %v150_v3  ;;  %v199_v8 = vadd.f32 %v198_v6, %v151_v4 }
  0xb5   :  { %v258_v9 = vmul.f32 0.044715, %v176_v7  ;;  %v259_v10 = vmul.f32 0.044715, %v199_v8  ;;  %v250_v55 = vmul.f32 0.5, %v176_v7  ;;  %v251_v57 = vmul.f32 0.5, %v199_v8 }
  0xb7   :  { %v266_v13 = vmul.f32 %v258_v9, %v176_v7  ;;  %v267_v14 = vmul.f32 %v259_v10, %v199_v8 }
  0xb9   :  { %v221_v15 = vpop.f32.mrf.mxu2  ;;  %v244_v16 = vpop.f32.mrf.mxu3  ;;  %v274_v17 = vmul.f32 %v266_v13, %v176_v7  ;;  %v275_v18 = vmul.f32 %v267_v14, %v199_v8 }
  0xba   :  { %v222_v19 = vadd.f32 %v221_v15, %v152_v11  ;;  %v245_v20 = vadd.f32 %v244_v16, %v153_v12  ;;  %v178_v21 = vpop.f32.mrf.mxu0  ;;  %v201_v22 = vpop.f32.mrf.mxu1 }
  0xbb   :  { %v716_v23 = vadd.f32 %v178_v21, %v150_v3  ;;  %v718_v24 = vadd.f32 %v201_v22, %v151_v4  ;;  %v282_v25 = vadd.f32 %v274_v17, %v176_v7  ;;  %v283_v26 = vadd.f32 %v275_v18, %v199_v8 }
  0xbc   :  { %v260_v27 = vmul.f32 0.044715, %v222_v19  ;;  %v261_v28 = vmul.f32 0.044715, %v245_v20  ;;  %v252_v7 = vmul.f32 0.5, %v222_v19  ;;  %v253_v9 = vmul.f32 0.5, %v245_v20 }
  0xbd   :  { %v290_v29 = vmul.f32 0.7978846, %v282_v25  ;;  %v291_v30 = vmul.f32 0.7978846, %v283_v26  ;;  %v262_v33 = vmul.f32 0.044715, %v716_v23 }
  0xbe   :  { %v268_v31 = vmul.f32 %v260_v27, %v222_v19  ;;  %v269_v32 = vmul.f32 %v261_v28, %v245_v20  ;;  %v263_v34 = vmul.f32 0.044715, %v718_v24  ;;  %v254_v17 = vmul.f32 0.5, %v716_v23 }
  0xbf   :  { %515 = vtanh.f32 %v290_v29  ;;  %v270_v37 = vmul.f32 %v262_v33, %v716_v23  ;;  %v255_v21 = vmul.f32 0.5, %v718_v24 }
  0xc0   :  { %517 = vtanh.f32 %v291_v30  ;;  %v276_v35 = vmul.f32 %v268_v31, %v222_v19  ;;  %v277_v36 = vmul.f32 %v269_v32, %v245_v20  ;;  %v271_v40 = vmul.f32 %v263_v34, %v718_v24 }
  0xc1   :  { %v224_v38 = vpop.f32.mrf.mxu2  ;;  %v247_v39 = vpop.f32.mrf.mxu3  ;;  %v278_v45 = vmul.f32 %v270_v37, %v716_v23 }
  0xc2   :  { %v225_v41 = vadd.f32 %v224_v38, %v152_v11  ;;  %v248_v42 = vadd.f32 %v247_v39, %v153_v12  ;;  %v284_v43 = vadd.f32 %v276_v35, %v222_v19  ;;  %v285_v44 = vadd.f32 %v277_v36, %v245_v20 }
  0xc3   :  { %v279_v46 = vmul.f32 %v271_v40, %v718_v24  ;;  %v286_v50 = vadd.f32 %v278_v45, %v716_v23 }
  0xc4   :  { %v292_v47 = vmul.f32 0.7978846, %v284_v43  ;;  %v293_v48 = vmul.f32 0.7978846, %v285_v44  ;;  %v264_v52 = vmul.f32 0.044715, %v225_v41 }
  0xc5   :  { %v516_v49 = vpop.eup %515  ;;  %v287_v51 = vadd.f32 %v279_v46, %v718_v24  ;;  %v265_v53 = vmul.f32 0.044715, %v248_v42  ;;  %v294_v59 = vmul.f32 0.7978846, %v286_v50  ;;  %v256_v27 = vmul.f32 0.5, %v225_v41 }
  0xc6   :  { %v518_v54 = vpop.eup %517  ;;  %v306_v56 = vadd.f32 1.0, %v516_v49  ;;  %519 = vtanh.f32 %v292_v47  ;;  %v272_v62 = vmul.f32 %v264_v52, %v225_v41  ;;  %v257_v29 = vmul.f32 0.5, %v248_v42  ;;  %v514_v24 = vld [vmem:[%s743_s4] ss:$0 sm:$0xff]  ;;  %s490_s4 = sshll.u32 %s744_s5, 4  ;;  %s491_s4 = int_to_ptr.hbm [resolvable:$true] %s490_s4 }
  0xc7   :  { %v307_v58 = vadd.f32 1.0, %v518_v54  ;;  %521 = vtanh.f32 %v293_v48  ;;  %v295_v60 = vmul.f32 0.7978846, %v287_v51  ;;  %v273_v63 = vmul.f32 %v265_v53, %v248_v42 }
  0xc8   :  { %v314_v61 = vmul.f32 %v306_v56, %v250_v55  ;;  %523 = vtanh.f32 %v294_v59  ;;  %v280_v1 = vmul.f32 %v272_v62, %v225_v41 }
  0xc9   :  { %v315_v0 = vmul.f32 %v307_v58, %v251_v57  ;;  %525 = vtanh.f32 %v295_v60  ;;  %v281_v2 = vmul.f32 %v273_v63, %v248_v42 }
  0xca   :  { %406 = vmatmul.f32.vlgmr.msrb.gmra.mxu0 %v314_v61  ;;  %v288_v4 = vadd.f32 %v280_v1, %v225_v41 }
  0xcb   :  { %429 = vmatmul.f32.vlgmr.msrb.gmra.mxu1 %v315_v0  ;;  %v289_v5 = vadd.f32 %v281_v2, %v248_v42 }
  0xcc   :  { %v520_v3 = vpop.eup %519  ;;  %v296_v11 = vmul.f32 0.7978846, %v288_v4 }
  0xcd   :  { %v522_v6 = vpop.eup %521  ;;  %v308_v8 = vadd.f32 1.0, %v520_v3  ;;  %v297_v12 = vmul.f32 0.7978846, %v289_v5 }
  0xce   :  { %v309_v10 = vadd.f32 1.0, %v522_v6  ;;  %v524_v13 = vpop.eup %523  ;;  %527 = vtanh.f32 %v296_v11 }
  0xcf   :  { %v316_v14 = vmul.f32 %v308_v8, %v252_v7  ;;  %v526_v15 = vpop.eup %525  ;;  %v310_v18 = vadd.f32 1.0, %v524_v13  ;;  %529 = vtanh.f32 %v297_v12 }
  0xd0   :  { %v317_v16 = vmul.f32 %v309_v10, %v253_v9  ;;  %v311_v22 = vadd.f32 1.0, %v526_v15 }
  0xd1   :  { %452 = vmatmul.f32.vlgmr.msrb.gmra.mxu2 %v316_v14  ;;  %v318_v19 = vmul.f32 %v310_v18, %v254_v17 }
  0xd2   :  { %475 = vmatmul.f32.vlgmr.msrb.gmra.mxu3 %v317_v16  ;;  %v319_v25 = vmul.f32 %v311_v22, %v255_v21 }
  0xd3   :  { %409 = vmatmul.f32.gmra.mxu0 %v318_v19 }
  0xd4   :  { %432 = vmatmul.f32.gmra.mxu1 %v319_v25  ;;  %v528_v20 = vpop.eup %527 }
  0xd5   :  { %v530_v26 = vpop.eup %529  ;;  %v312_v28 = vadd.f32 1.0, %v528_v20 }
  0xd6   :  { %v313_v30 = vadd.f32 1.0, %v530_v26 }
  0xd7   :  { %v320_v31 = vmul.f32 %v312_v28, %v256_v27 }
  0xd8   :  { %v321_v23 = vmul.f32 %v313_v30, %v257_v29 }
  0xd9   :  { %455 = vmatmul.f32.gmra.mxu2 %v320_v31 }
  0xda   :  { %478 = vmatmul.f32.gmra.mxu3 %v321_v23 }
 0x147   :  { %v407_v32 = vpop.f32.mrf.mxu0 }
 0x148   :  { %v408_v33 = vadd.f32 %v514_v24, %v407_v32  ;;  %v430_v34 = vpop.f32.mrf.mxu1 }
 0x14a   :  { %v431_v35 = vadd.f32 %v430_v34, %v408_v33 }
 0x150   :  { %v410_v38 = vpop.f32.mrf.mxu0 }
 0x151   :  { %v411_v41 = vadd.f32 %v514_v24, %v410_v38  ;;  %v433_v42 = vpop.f32.mrf.mxu1 }
 0x153   :  { %v434_v43 = vadd.f32 %v433_v42, %v411_v41 }
 0x154   :  { %v453_v36 = vpop.f32.mrf.mxu2 }
 0x155   :  { %v454_v37 = vadd.f32 %v453_v36, %v431_v35  ;;  %v476_v39 = vpop.f32.mrf.mxu3 }
 0x157   :  { %v477_v40 = vadd.f32 %v476_v39, %v454_v37 }
 0x159   :  { %482 = vst [vmem:[#allocation10] sm:$0xff] %v477_v40 }
 0x15c   :  { %v456_v44 = vpop.f32.mrf.mxu2 }
 0x15d   :  { %v457_v45 = vadd.f32 %v456_v44, %v434_v43  ;;  %v479_v46 = vpop.f32.mrf.mxu3 }
 0x15f   :  { %v480_v47 = vadd.f32 %v479_v46, %v457_v45 }
 0x161   :  { %483 = vst [vmem:[#allocation10 + $0x8] sm:$0xff] %v480_v47 }
 0x162   :  { %496 = dma.vmem_to_hbm [thread:$0]  %s489_s16, 256, %s491_s4, [#allocation4], %s663_s30, %s663_s30, %s664_s6  }
 0x163   :  { %657 = dma.done.wait [#allocation4], 256  }
 0x164   :  { %658 = vsyncadd [#allocation4], 4294967040 }
 0x165   :  { %501 = vsyncpa [#allocation3], 1 }
 0x166   :  { %502 = vsyncpa [#allocation6], 1 }
 0x167   :  { %503 = vsyncpa [#allocation9], 1 }
 0x168   :  { %504 = vsyncpa [#allocation4], 1 }

</bundles_post_ra>
